<compile_context>
chip_gen: v5e
topology: v5e:2x2
jax: 0.10.0
libtpu: 0.0.40
codegen_flags: <defaults>
</compile_context>

<pallas_src>
import jax
import jax.numpy as jnp
from jax.experimental import pallas as pl
from jax.experimental.pallas import tpu as pltpu

D_IN = 768
D_HID = 256
D_OUT = 128


def _round_up(n, m):
    return ((n + m - 1) // m) * m


def _choose_batch_tile(B, block_b):
    """Batch tile: sublane-aligned, 128-aligned when large, >=2 grid steps
    whenever B allows it (engages both v7x TensorCores)."""
    block_b = max(8, _round_up(block_b, 8))
    steps = max(2, pl.cdiv(B, block_b))
    tb = _round_up(pl.cdiv(B, steps), 8)
    if tb > 128:
        tb = _round_up(tb, 128)
    return min(tb, block_b)


def _mlp_kernel(x_ref, w1_ref, b1_ref, w2_ref, b2_ref, o_ref):
    # x_ref:  (TB, D_IN)    HBM dtype (f32 or bf16) -> cast here to compute dtype
    # w1_ref: (D_IN, D_HID) compute dtype   w2_ref: (D_HID, D_OUT) compute dtype
    # b1_ref: (1, D_HID)    float32         b2_ref: (1, D_OUT)     float32
    # o_ref:  (TB, D_OUT)   out dtype
    x = x_ref[...].astype(w1_ref.dtype)                       # in-kernel cast (VPU, hidden under DMA)
    h = jnp.dot(x, w1_ref[...], preferred_element_type=jnp.float32)
    h = jnp.maximum(h + b1_ref[...], 0.0)                     # bias + ReLU in f32
    o = jnp.dot(h.astype(w2_ref.dtype), w2_ref[...],
                preferred_element_type=jnp.float32)
    o_ref[...] = (o + b2_ref[...]).astype(o_ref.dtype)


def prepare_params(w1, b1, w2, b2, compute_dtype=jnp.bfloat16):
    """Cast/reshape parameters once (do NOT redo this per forward call)."""
    return (w1.astype(compute_dtype),
            b1.reshape(1, D_HID).astype(jnp.float32),
            w2.astype(compute_dtype),
            b2.reshape(1, D_OUT).astype(jnp.float32))


def language_model_forward(x, w1c, b1_2d, w2c, b2_2d, *, block_b=1024,
                           out_dtype=jnp.float32):
    """x: [B, D_IN] (f32, or bf16 if cached upstream — preferred on v5e).
    w1c/w2c: compute-dtype weights [D_in, D_out]; b*_2d: f32 [1, D_out].
    Returns [B, D_OUT] in out_dtype (default f32, matching the PyTorch module).
    """
    B = x.shape[0]
    tb = _choose_batch_tile(B, block_b)
    grid = (pl.cdiv(B, tb),)

    x_isz = x.dtype.itemsize
    w_isz = w1c.dtype.itemsize
    o_isz = jnp.dtype(out_dtype).itemsize

    cost = pl.CostEstimate(
        flops=2 * B * (D_IN * D_HID + D_HID * D_OUT),
        transcendentals=0,
        bytes_accessed=(B * D_IN * x_isz
                        + (D_IN * D_HID + D_HID * D_OUT) * w_isz
                        + (D_HID + D_OUT) * 4
                        + B * D_OUT * o_isz),
    )

    # VMEM budget: double-buffered x/out tiles + resident weights + f32/bf16
    # intermediates + headroom; capped at 48 MiB (safe on v7x's 64 MiB VMEM).
    vmem_need = (2 * tb * D_IN * x_isz
                 + 2 * tb * D_OUT * o_isz
                 + 2 * (D_IN * D_HID + D_HID * D_OUT) * w_isz
                 + tb * (D_IN + D_HID) * w_isz
                 + tb * D_HID * 4
                 + (2 << 20))
    vmem_limit = int(min(max(vmem_need, 16 << 20), 48 << 20))

    return pl.pallas_call(
        _mlp_kernel,
        out_shape=jax.ShapeDtypeStruct((B, D_OUT), out_dtype),
        grid_spec=pltpu.PrefetchScalarGridSpec(
            num_scalar_prefetch=0,
            grid=grid,
            in_specs=[
                pl.BlockSpec((tb, D_IN), lambda i: (i, 0)),      # x tile (ragged tail OK)
                pl.BlockSpec((D_IN, D_HID), lambda i: (0, 0)),   # W1 (VMEM-resident)
                pl.BlockSpec((1, D_HID), lambda i: (0, 0)),      # b1
                pl.BlockSpec((D_HID, D_OUT), lambda i: (0, 0)),  # W2 (VMEM-resident)
                pl.BlockSpec((1, D_OUT), lambda i: (0, 0)),      # b2
            ],
            out_specs=pl.BlockSpec((tb, D_OUT), lambda i: (i, 0)),
        ),
        compiler_params=pltpu.CompilerParams(
            dimension_semantics=("parallel",),   # batch tiles shard across v7x TCs
            vmem_limit_bytes=vmem_limit,
        ),
        cost_estimate=cost,
    )(x, w1c, b1_2d, w2c, b2_2d)


def _ref_forward(x, w1, b1, w2, b2, compute_dtype=jnp.bfloat16):
    # Plain-JAX reference with the same operand rounding as the kernel.
    cd = compute_dtype
    xr = x.astype(jnp.float32).astype(cd).astype(jnp.float32)
    w1r = w1.astype(cd).astype(jnp.float32)
    w2r = w2.astype(cd).astype(jnp.float32)
    h = jnp.maximum(xr @ w1r + b1.reshape(1, -1).astype(jnp.float32), 0.0)
    h = h.astype(cd).astype(jnp.float32)
    return h @ w2r + b2.reshape(1, -1).astype(jnp.float32)


def _init_params(key):
    # Mimics nn.Linear's uniform(-1/sqrt(fan_in), 1/sqrt(fan_in)) init.
    k1, k2, k3, k4 = jax.random.split(key, 4)
    lim1 = 1.0 / (D_IN ** 0.5)
    lim2 = 1.0 / (D_HID ** 0.5)
    w1 = jax.random.uniform(k1, (D_IN, D_HID), jnp.float32, -lim1, lim1)
    b1 = jax.random.uniform(k2, (D_HID,), jnp.float32, -lim1, lim1)
    w2 = jax.random.uniform(k3, (D_HID, D_OUT), jnp.float32, -lim2, lim2)
    b2 = jax.random.uniform(k4, (D_OUT,), jnp.float32, -lim2, lim2)
    return w1, b1, w2, b2


if __name__ == "__main__":
    key = jax.random.PRNGKey(0)
    kx, kx2, kp = jax.random.split(key, 3)
    w1, b1, w2, b2 = _init_params(kp)

    # Parameters are cast/reshaped exactly once and reused across calls.
    w1c, b1_2d, w2c, b2_2d = prepare_params(w1, b1, w2, b2)

    # Small demo batch (single ragged block, no padding / no output slice).
    B = 8
    x = jax.random.normal(kx, (B, D_IN), dtype=jnp.float32)
    out = language_model_forward(x, w1c, b1_2d, w2c, b2_2d)
    out = jax.block_until_ready(out)
    ref = _ref_forward(x, w1, b1, w2, b2)
    assert out.shape == (B, D_OUT)
    assert out.dtype == jnp.float32
    assert jnp.allclose(out, ref, atol=2e-2, rtol=2e-2), "mismatch vs reference (B=8)"

    # Non-multiple batch: exercises >=2 grid steps + masked ragged final block.
    B2 = 300
    x2 = jax.random.normal(kx2, (B2, D_IN), dtype=jnp.float32)
    out2 = language_model_forward(x2, w1c, b1_2d, w2c, b2_2d, block_b=1024)
    out2 = jax.block_until_ready(out2)
    ref2 = _ref_forward(x2, w1, b1, w2, b2)
    assert out2.shape == (B2, D_OUT)
    assert jnp.allclose(out2, ref2, atol=2e-2, rtol=2e-2), "mismatch vs reference (B=300)"

    print("KERNEL_OK")
</pallas_src>

<mosaic_0001>
module attributes {stable_mosaic.version = 11 : i64} {
  func.func @_mlp_kernel(%arg0: i32, %arg1: memref<8x768xf32, #tpu.memory_space<vmem>>, %arg2: memref<768x256xbf16, #tpu.memory_space<vmem>>, %arg3: memref<1x256xf32, #tpu.memory_space<vmem>>, %arg4: memref<256x128xbf16, #tpu.memory_space<vmem>>, %arg5: memref<1x128xf32, #tpu.memory_space<vmem>>, %arg6: memref<8x128xf32, #tpu.memory_space<vmem>>) attributes {dimension_semantics = [#tpu.dimension_semantics<parallel>], iteration_bounds = array<i64: 1>, scalar_prefetch = 0 : i64, scratch_operands = 0 : i64, tpu.core_type = #tpu.core_type<tc>, window_params = [{transform_indices = @transform_0, window_bounds = array<i64: 8, 768>}, {pipeline_mode = #tpu.pipeline_mode<synchronous>, transform_indices = @transform_1, window_bounds = array<i64: 768, 256>}, {pipeline_mode = #tpu.pipeline_mode<synchronous>, transform_indices = @transform_2, window_bounds = array<i64: 1, 256>}, {pipeline_mode = #tpu.pipeline_mode<synchronous>, transform_indices = @transform_3, window_bounds = array<i64: 256, 128>}, {pipeline_mode = #tpu.pipeline_mode<synchronous>, transform_indices = @transform_4, window_bounds = array<i64: 1, 128>}, {transform_indices = @transform_5, window_bounds = array<i64: 8, 128>}]} {
    %c0 = arith.constant 0 : index
    %c0_0 = arith.constant 0 : index
    %0 = vector.load %arg1[%c0, %c0_0] : memref<8x768xf32, #tpu.memory_space<vmem>>, vector<8x768xf32>
    %1 = arith.truncf %0 : vector<8x768xf32> to vector<8x768xbf16>
    %c0_1 = arith.constant 0 : index
    %c0_2 = arith.constant 0 : index
    %2 = vector.load %arg2[%c0_1, %c0_2] : memref<768x256xbf16, #tpu.memory_space<vmem>>, vector<768x256xbf16>
    %cst = arith.constant dense<0.000000e+00> : vector<8x256xf32>
    %3 = tpu.matmul %1, %2, %cst {dimension_numbers = #tpu.dot_dimension_numbers<[1], [0], [0], [1], [0, 0, 1, 1], [], []>} : vector<8x768xbf16>, vector<768x256xbf16>, vector<8x256xf32> -> vector<8x256xf32>
    %c0_3 = arith.constant 0 : index
    %c0_4 = arith.constant 0 : index
    %4 = vector.load %arg3[%c0_3, %c0_4] : memref<1x256xf32, #tpu.memory_space<vmem>>, vector<1x256xf32>
    %5 = vector.broadcast %4 : vector<1x256xf32> to vector<8x256xf32>
    %6 = arith.addf %3, %5 : vector<8x256xf32>
    %cst_5 = arith.constant 0.000000e+00 : f32
    %7 = vector.broadcast %cst_5 : f32 to vector<8x256xf32>
    %8 = arith.maximumf %6, %7 : vector<8x256xf32>
    %9 = arith.truncf %8 : vector<8x256xf32> to vector<8x256xbf16>
    %c0_6 = arith.constant 0 : index
    %c0_7 = arith.constant 0 : index
    %10 = vector.load %arg4[%c0_6, %c0_7] : memref<256x128xbf16, #tpu.memory_space<vmem>>, vector<256x128xbf16>
    %cst_8 = arith.constant dense<0.000000e+00> : vector<8x128xf32>
    %11 = tpu.matmul %9, %10, %cst_8 {dimension_numbers = #tpu.dot_dimension_numbers<[1], [0], [0], [1], [0, 0, 1, 1], [], []>} : vector<8x256xbf16>, vector<256x128xbf16>, vector<8x128xf32> -> vector<8x128xf32>
    %c0_9 = arith.constant 0 : index
    %c0_10 = arith.constant 0 : index
    %12 = vector.load %arg5[%c0_9, %c0_10] : memref<1x128xf32, #tpu.memory_space<vmem>>, vector<1x128xf32>
    %13 = vector.broadcast %12 : vector<1x128xf32> to vector<8x128xf32>
    %14 = arith.addf %11, %13 : vector<8x128xf32>
    %c0_11 = arith.constant 0 : index
    %c0_12 = arith.constant 0 : index
    %15 = vector.load %arg6[%c0_11, %c0_12] : memref<8x128xf32, #tpu.memory_space<vmem>>, vector<8x128xf32>
    tpu.vector_store %arg6[%c0_11, %c0_12], %14 {strides = array<i32>} : memref<8x128xf32, #tpu.memory_space<vmem>>, vector<8x128xf32>,
    return
  }
  func.func @transform_0(%arg0: i32) -> (i32, i32) {
    %c0_i32 = arith.constant 0 : i32
    %c0_i32_0 = arith.constant 0 : i32
    return %arg0, %c0_i32 : i32, i32
  }
  func.func @transform_1(%arg0: i32) -> (i32, i32) {
    %c0_i32 = arith.constant 0 : i32
    %c0_i32_0 = arith.constant 0 : i32
    %c0_i32_1 = arith.constant 0 : i32
    return %c0_i32, %c0_i32_0 : i32, i32
  }
  func.func @transform_2(%arg0: i32) -> (i32, i32) {
    %c0_i32 = arith.constant 0 : i32
    %c0_i32_0 = arith.constant 0 : i32
    %c0_i32_1 = arith.constant 0 : i32
    return %c0_i32, %c0_i32_0 : i32, i32
  }
  func.func @transform_3(%arg0: i32) -> (i32, i32) {
    %c0_i32 = arith.constant 0 : i32
    %c0_i32_0 = arith.constant 0 : i32
    %c0_i32_1 = arith.constant 0 : i32
    return %c0_i32, %c0_i32_0 : i32, i32
  }
  func.func @transform_4(%arg0: i32) -> (i32, i32) {
    %c0_i32 = arith.constant 0 : i32
    %c0_i32_0 = arith.constant 0 : i32
    %c0_i32_1 = arith.constant 0 : i32
    return %c0_i32, %c0_i32_0 : i32, i32
  }
  func.func @transform_5(%arg0: i32) -> (i32, i32) {
    %c0_i32 = arith.constant 0 : i32
    %c0_i32_0 = arith.constant 0 : i32
    return %arg0, %c0_i32 : i32, i32
  }
}

</mosaic_0001>

<bundles_post_ra>
// kernel: tpu_custom_call.1
= control target key start
LH: loop header
LB: loop body
LE: loop exit
PB: predicated region body
PF: predicated region fallthrough
CT: control target
= control target key end

     0   :  { %10 = vsyncpa [#allocation3], 0  ;;  %s1791_s0 = inlined_call_operand.hbm [shape: f32[8,768], index: 0, kind: input, shape index: {}]   ;;  %s1792_s1 = inlined_call_operand.hbm [shape: bf16[768,256], index: 1, kind: input, shape index: {}]   ;;  %s1793_s2 = inlined_call_operand.hbm [shape: f32[1,256], index: 2, kind: input, shape index: {}]   ;;  %s1794_s3 = inlined_call_operand.hbm [shape: bf16[256,128], index: 3, kind: input, shape index: {}]   ;;  %s1795_s4 = inlined_call_operand.vmem [shape: f32[1,128], index: 4, kind: input, shape index: {}]   ;;  %s1796_s5 = inlined_call_operand.hbm [shape: f32[8,128], index: 5, kind: output, shape index: {}]  }
   0x1   :  { %11 = vsyncpa [#allocation6], 0 }
   0x2   :  { %12 = vsyncpa [#allocation9], 0  ;;  %s29_s20 = sshll.u32 %s1792_s1, 4  ;;  %s30_s20 = int_to_ptr.hbm [resolvable:$true] %s29_s20 }
   0x3   :  { %13 = vsyncpa [#allocation4], 0  ;;  %s1710_s21 = smov [#allocation5]   ;;  %s19_s25 = sshll.u32 %s1791_s0, 4  ;;  %s20_s25 = int_to_ptr.hbm [resolvable:$true] %s19_s25 }
   0x4   :  { %s31_s22 = sshll.u32 %s1710_s21, 4  ;;  %s1711_s26 = smov 128   ;;  %s32_s22 = int_to_ptr.vmem [resolvable:$true] %s31_s22 }
   0x5   :  { %s1712_s27 = smov 8   ;;  %s1713_s28 = smov [#allocation2]  }
   0x6   :  { %37 = dma.hbm_to_vmem [thread:$0]  %s30_s20, 12288, %s32_s22, [#allocation6], %s1711_s26, %s1711_s26, %s1712_s27  }
   0x7   :  { %s21_s29 = sshll.u32 %s1713_s28, 4  ;;  %s43_s7 = sshll.u32 %s1793_s2, 4  ;;  %s22_s29 = int_to_ptr.vmem [resolvable:$true] %s21_s29  ;;  %s44_s7 = int_to_ptr.hbm [resolvable:$true] %s43_s7 }
   0x8   :  { %24 = dma.hbm_to_vmem [thread:$0]  %s20_s25, 768, %s22_s29, [#allocation3]  }
   0x9   :  { %s53_s9 = sshll.u32 %s1794_s3, 4  ;;  %s1714_s10 = smov [#allocation7]   ;;  %s54_s9 = int_to_ptr.hbm [resolvable:$true] %s53_s9 }
   0xa   :  { %s45_s11 = sshll.u32 %s1714_s10, 4  ;;  %s1715_s0 = smov [#allocation8]   ;;  %s46_s11 = int_to_ptr.vmem [resolvable:$true] %s45_s11 }
   0xb   :  { %48 = dma.hbm_to_vmem [thread:$0]  %s44_s7, 32, %s46_s11, [#allocation6]  }
   0xc   :  { %s55_s12 = sshll.u32 %s1715_s0, 4  ;;  %s1716_s13 = smov 64   ;;  %s56_s12 = int_to_ptr.vmem [resolvable:$true] %s55_s12 }
   0xd   :  { %s1717_s14 = smov 4  }
   0xe   :  { %61 = dma.hbm_to_vmem [thread:$0]  %s54_s9, 2048, %s56_s12, [#allocation9], %s1716_s13, %s1716_s13, %s1717_s14  }
   0xf   :  { %1702 = dma.done.wait [#allocation3], 768  }
  0x10   :  { %1703 = vsyncadd [#allocation3], 4294966528 }
  0x11   :  { %1704 = dma.done.wait [#allocation6], 12320  }
  0x12   :  { %1705 = vsyncadd [#allocation6], 4294954976 }
  0x13   :  { %1706 = dma.done.wait [#allocation9], 2048  }
  0x14   :  { %1707 = vsyncadd [#allocation9], 4294965248  ;;  %v1070_v0 = vld [vmem:[#allocation5 + $0x70] sm:$0xf]  ;;  %v1475_v1 = vld [vmem:[#allocation5 + $0x74] sm:$0xf0] }
  0x15   :  { %v1134_v2 = vld [vmem:[#allocation5 + $0xf0] sm:$0xf]  ;;  %v1071_v3 = vor.u32 %v1475_v1, %v1070_v0  ;;  %v1491_v4 = vld [vmem:[#allocation5 + $0xf4] sm:$0xf0]  ;;  %v1062_v11 = vld [vmem:[#allocation5 + $0x60] sm:$0xf] }
  0x16   :  { %v1198_v5 = vld [vmem:[#allocation5 + $0x170] sm:$0xf]  ;;  %v1507_v6 = vld [vmem:[#allocation5 + $0x174] sm:$0xf0]  ;;  %v1135_v7 = vor.u32 %v1491_v4, %v1134_v2  ;;  %v1473_v13 = vld [vmem:[#allocation5 + $0x64] sm:$0xf0] }
  0x17   :  { %v1199_v8 = vor.u32 %v1507_v6, %v1198_v5  ;;  %v1262_v9 = vld [vmem:[#allocation5 + $0x1f0] sm:$0xf]  ;;  %v1523_v10 = vld [vmem:[#allocation5 + $0x1f4] sm:$0xf0]  ;;  %674 = vmatpush.bf16.msra.mxu0 %v1071_v3  ;;  %v1126_v14 = vld [vmem:[#allocation5 + $0xe0] sm:$0xf]  ;;  %v1063_v16 = vor.u32 %v1473_v13, %v1062_v11 }
  0x18   :  { %v1263_v12 = vor.u32 %v1523_v10, %v1262_v9  ;;  %v1489_v15 = vld [vmem:[#allocation5 + $0xe4] sm:$0xf0]  ;;  %687 = vmatpush.bf16.msra.mxu1 %v1135_v7  ;;  %v1190_v18 = vld [vmem:[#allocation5 + $0x160] sm:$0xf]  ;;  %v1054_v23 = vld [vmem:[#allocation5 + $0x50] sm:$0xf] }
  0x19   :  { %700 = vmatpush.bf16.msra.mxu2 %v1199_v8  ;;  %v1127_v17 = vor.u32 %v1489_v15, %v1126_v14  ;;  %v1505_v19 = vld [vmem:[#allocation5 + $0x164] sm:$0xf0]  ;;  %v1254_v20 = vld [vmem:[#allocation5 + $0x1e0] sm:$0xf]  ;;  %v1471_v24 = vld [vmem:[#allocation5 + $0x54] sm:$0xf0] }
  0x1a   :  { %713 = vmatpush.bf16.msra.mxu3 %v1263_v12  ;;  %v1191_v21 = vor.u32 %v1505_v19, %v1190_v18  ;;  %v1521_v22 = vld [vmem:[#allocation5 + $0x1e4] sm:$0xf0]  ;;  %v1118_v26 = vld [vmem:[#allocation5 + $0xd0] sm:$0xf]  ;;  %v1487_v27 = vld [vmem:[#allocation5 + $0xd4] sm:$0xf0]  ;;  %v1055_v29 = vor.u32 %v1471_v24, %v1054_v23 }
  0x1b   :  { %v1255_v25 = vor.u32 %v1521_v22, %v1254_v20  ;;  %v1182_v28 = vld [vmem:[#allocation5 + $0x150] sm:$0xf]  ;;  %675 = vmatpush.bf16.msra.mxu0 %v1063_v16  ;;  %v1503_v30 = vld [vmem:[#allocation5 + $0x154] sm:$0xf0]  ;;  %v1119_v33 = vor.u32 %v1487_v27, %v1118_v26  ;;  %v1046_v35 = vld [vmem:[#allocation5 + $0x40] sm:$0xf] }
  0x1c   :  { %v1246_v31 = vld [vmem:[#allocation5 + $0x1d0] sm:$0xf]  ;;  %v1519_v32 = vld [vmem:[#allocation5 + $0x1d4] sm:$0xf0]  ;;  %688 = vmatpush.bf16.msra.mxu1 %v1127_v17  ;;  %v1183_v34 = vor.u32 %v1503_v30, %v1182_v28  ;;  %v1469_v36 = vld [vmem:[#allocation5 + $0x44] sm:$0xf0] }
  0x1d   :  { %701 = vmatpush.bf16.msra.mxu2 %v1191_v21  ;;  %v1110_v37 = vld [vmem:[#allocation5 + $0xc0] sm:$0xf]  ;;  %v1247_v38 = vor.u32 %v1519_v32, %v1246_v31  ;;  %v1485_v39 = vld [vmem:[#allocation5 + $0xc4] sm:$0xf0]  ;;  %v1047_v44 = vor.u32 %v1469_v36, %v1046_v35  ;;  %v1038_v47 = vld [vmem:[#allocation5 + $0x30] sm:$0xf] }
  0x1e   :  { %714 = vmatpush.bf16.msra.mxu3 %v1255_v25  ;;  %v1174_v40 = vld [vmem:[#allocation5 + $0x140] sm:$0xf]  ;;  %v1501_v41 = vld [vmem:[#allocation5 + $0x144] sm:$0xf0]  ;;  %v1111_v45 = vor.u32 %v1485_v39, %v1110_v37  ;;  %v1467_v48 = vld [vmem:[#allocation5 + $0x34] sm:$0xf0] }
  0x1f   :  { %v1238_v42 = vld [vmem:[#allocation5 + $0x1c0] sm:$0xf]  ;;  %v1517_v43 = vld [vmem:[#allocation5 + $0x1c4] sm:$0xf0]  ;;  %676 = vmatpush.bf16.msra.mxu0 %v1055_v29  ;;  %v1175_v46 = vor.u32 %v1501_v41, %v1174_v40  ;;  %v1102_v49 = vld [vmem:[#allocation5 + $0xb0] sm:$0xf]  ;;  %v1039_v56 = vor.u32 %v1467_v48, %v1038_v47 }
  0x20   :  { %689 = vmatpush.bf16.msra.mxu1 %v1119_v33  ;;  %v1239_v50 = vor.u32 %v1517_v43, %v1238_v42  ;;  %v1483_v51 = vld [vmem:[#allocation5 + $0xb4] sm:$0xf0]  ;;  %v1166_v52 = vld [vmem:[#allocation5 + $0x130] sm:$0xf]  ;;  %v1030_v59 = vld [vmem:[#allocation5 + $0x20] sm:$0xf] }
  0x21   :  { %702 = vmatpush.bf16.msra.mxu2 %v1183_v34  ;;  %v1499_v53 = vld [vmem:[#allocation5 + $0x134] sm:$0xf0]  ;;  %v1230_v54 = vld [vmem:[#allocation5 + $0x1b0] sm:$0xf]  ;;  %v1103_v57 = vor.u32 %v1483_v51, %v1102_v49  ;;  %v1465_v60 = vld [vmem:[#allocation5 + $0x24] sm:$0xf0] }
  0x22   :  { %715 = vmatpush.bf16.msra.mxu3 %v1247_v38  ;;  %v1515_v55 = vld [vmem:[#allocation5 + $0x1b4] sm:$0xf0]  ;;  %v1167_v58 = vor.u32 %v1499_v53, %v1166_v52  ;;  %v1094_v61 = vld [vmem:[#allocation5 + $0xa0] sm:$0xf]  ;;  %v1481_v63 = vld [vmem:[#allocation5 + $0xa4] sm:$0xf0]  ;;  %v1031_v4 = vor.u32 %v1465_v60, %v1030_v59 }
  0x23   :  { %677 = vmatpush.bf16.msra.mxu0 %v1047_v44  ;;  %v1231_v62 = vor.u32 %v1515_v55, %v1230_v54  ;;  %v1158_v0 = vld [vmem:[#allocation5 + $0x120] sm:$0xf]  ;;  %v1497_v1 = vld [vmem:[#allocation5 + $0x124] sm:$0xf0]  ;;  %v1095_v5 = vor.u32 %v1481_v63, %v1094_v61  ;;  %v1022_v7 = vld [vmem:[#allocation5 + $0x10] sm:$0xf] }
  0x24   :  { %690 = vmatpush.bf16.msra.mxu1 %v1111_v45  ;;  %v1222_v2 = vld [vmem:[#allocation5 + $0x1a0] sm:$0xf]  ;;  %v1513_v3 = vld [vmem:[#allocation5 + $0x1a4] sm:$0xf0]  ;;  %v1159_v6 = vor.u32 %v1497_v1, %v1158_v0  ;;  %v1463_v8 = vld [vmem:[#allocation5 + $0x14] sm:$0xf0] }
  0x25   :  { %703 = vmatpush.bf16.msra.mxu2 %v1175_v46  ;;  %v1086_v9 = vld [vmem:[#allocation5 + $0x90] sm:$0xf]  ;;  %v1223_v10 = vor.u32 %v1513_v3, %v1222_v2  ;;  %v1479_v11 = vld [vmem:[#allocation5 + $0x94] sm:$0xf0]  ;;  %v1023_v16 = vor.u32 %v1463_v8, %v1022_v7  ;;  %v1014_v17 = vld [vmem:[#allocation5] sm:$0xf] }
  0x26   :  { %716 = vmatpush.bf16.msra.mxu3 %v1239_v50  ;;  %v1150_v12 = vld [vmem:[#allocation5 + $0x110] sm:$0xf]  ;;  %v1495_v13 = vld [vmem:[#allocation5 + $0x114] sm:$0xf0]  ;;  %v1461_v18 = vld [vmem:[#allocation5 + $0x4] sm:$0xf0]  ;;  %v1087_v19 = vor.u32 %v1479_v11, %v1086_v9 }
  0x27   :  { %678 = vmatpush.bf16.msra.mxu0 %v1039_v56  ;;  %v1214_v14 = vld [vmem:[#allocation5 + $0x190] sm:$0xf]  ;;  %v1511_v15 = vld [vmem:[#allocation5 + $0x194] sm:$0xf0]  ;;  %v1151_v20 = vor.u32 %v1495_v13, %v1150_v12  ;;  %v1078_v21 = vld [vmem:[#allocation5 + $0x80] sm:$0xf]  ;;  %v1015_v31 = vor.u32 %v1461_v18, %v1014_v17 }
  0x28   :  { %691 = vmatpush.bf16.msra.mxu1 %v1103_v57  ;;  %v1477_v22 = vld [vmem:[#allocation5 + $0x84] sm:$0xf0]  ;;  %v1142_v23 = vld [vmem:[#allocation5 + $0x100] sm:$0xf]  ;;  %v1215_v24 = vor.u32 %v1511_v15, %v1214_v14  ;;  %v1326_v28 = vld [vmem:[#allocation5 + $0x270] sm:$0xf] }
  0x29   :  { %704 = vmatpush.bf16.msra.mxu2 %v1167_v58  ;;  %v1493_v25 = vld [vmem:[#allocation5 + $0x104] sm:$0xf0]  ;;  %v1206_v26 = vld [vmem:[#allocation5 + $0x180] sm:$0xf]  ;;  %v1539_v29 = vld [vmem:[#allocation5 + $0x274] sm:$0xf0]  ;;  %v1079_v35 = vor.u32 %v1477_v22, %v1078_v21 }
  0x2a   :  { %717 = vmatpush.bf16.msra.mxu3 %v1231_v62  ;;  %v1509_v27 = vld [vmem:[#allocation5 + $0x184] sm:$0xf0]  ;;  %v1390_v30 = vld [vmem:[#allocation5 + $0x2f0] sm:$0xf]  ;;  %v1555_v32 = vld [vmem:[#allocation5 + $0x2f4] sm:$0xf0]  ;;  %v1143_v36 = vor.u32 %v1493_v25, %v1142_v23  ;;  %v1327_v40 = vor.u32 %v1539_v29, %v1326_v28 }
  0x2b   :  { %679 = vmatpush.bf16.msra.mxu0 %v1031_v4  ;;  %v1474_v33 = vld [vmem:[#allocation5 + $0x74] sm:$0xf]  ;;  %v1072_v34 = vld [vmem:[#allocation5 + $0x78] sm:$0xf0]  ;;  %v1207_v39 = vor.u32 %v1509_v27, %v1206_v26  ;;  %v1391_v41 = vor.u32 %v1555_v32, %v1390_v30  ;;  %v1318_v43 = vld [vmem:[#allocation5 + $0x260] sm:$0xf] }
  0x2c   :  { %692 = vmatpush.bf16.msra.mxu1 %v1095_v5  ;;  %v1490_v37 = vld [vmem:[#allocation5 + $0xf4] sm:$0xf]  ;;  %v1136_v38 = vld [vmem:[#allocation5 + $0xf8] sm:$0xf0]  ;;  %v1075_v42 = vor.u32 %v1474_v33, %v1072_v34  ;;  %v1537_v44 = vld [vmem:[#allocation5 + $0x264] sm:$0xf0] }
  0x2d   :  { %705 = vmatpush.bf16.msra.mxu2 %v1159_v6  ;;  %v1382_v45 = vld [vmem:[#allocation5 + $0x2e0] sm:$0xf]  ;;  %v1139_v46 = vor.u32 %v1490_v37, %v1136_v38  ;;  %v1553_v47 = vld [vmem:[#allocation5 + $0x2e4] sm:$0xf0]  ;;  %v1472_v48 = vld [vmem:[#allocation5 + $0x64] sm:$0xf]  ;;  %v1319_v53 = vor.u32 %v1537_v44, %v1318_v43 }
  0x2e   :  { %718 = vmatpush.bf16.msra.mxu3 %v1223_v10  ;;  %v1064_v49 = vld [vmem:[#allocation5 + $0x68] sm:$0xf0]  ;;  %v1488_v50 = vld [vmem:[#allocation5 + $0xe4] sm:$0xf]  ;;  %v80_v52 = vld [vmem:[#allocation2] sm:$0xff]  ;;  %v1383_v57 = vor.u32 %v1553_v47, %v1382_v45  ;;  %s1718_s15 = smov [#allocation10]  }
  0x2f   :  { %680 = vmatpush.bf16.msra.mxu0 %v1023_v16  ;;  %v1128_v51 = vld [vmem:[#allocation5 + $0xe8] sm:$0xf0]  ;;  %v1310_v54 = vld [vmem:[#allocation5 + $0x250] sm:$0xf]  ;;  %v1535_v55 = vld [vmem:[#allocation5 + $0x254] sm:$0xf0]  ;;  %v1761_v56 = vpack.c.bf16 %v80_v52, %v80_v52  ;;  %v1067_v58 = vor.u32 %v1472_v48, %v1064_v49 }
  0x30   :  { %693 = vmatpush.bf16.msra.mxu1 %v1087_v19  ;;  %v1374_v59 = vld [vmem:[#allocation5 + $0x2d0] sm:$0xf]  ;;  %v1551_v60 = vld [vmem:[#allocation5 + $0x2d4] sm:$0xf0]  ;;  %v1470_v61 = vld [vmem:[#allocation5 + $0x54] sm:$0xf]  ;;  %v1131_v62 = vor.u32 %v1488_v50, %v1128_v51  ;;  %v1311_v6 = vor.u32 %v1535_v55, %v1310_v54 }
  0x31   :  { %706 = vmatpush.bf16.msra.mxu2 %v1151_v20  ;;  %v1056_v63 = vld [vmem:[#allocation5 + $0x58] sm:$0xf0]  ;;  %v82_v1 = vld [vmem:[#allocation2 + $0x10] sm:$0xff]  ;;  %v1486_v2 = vld [vmem:[#allocation5 + $0xd4] sm:$0xf]  ;;  %v1375_v8 = vor.u32 %v1551_v60, %v1374_v59  ;;  %s998_s16 = sshll.u32 %s1718_s15, 4  ;;  %s999_s16 = int_to_ptr.vmem [resolvable:$true] %s998_s16 }
  0x32   :  { %719 = vmatpush.bf16.msra.mxu3 %v1215_v24  ;;  %v81_v0 = vld [vmem:[#allocation2 + $0x8] sm:$0xff]  ;;  %v1766_v5 = vpack.c.bf16 %v82_v1, %v82_v1  ;;  %v1302_v7 = vld [vmem:[#allocation5 + $0x240] sm:$0xf]  ;;  %v1059_v9 = vor.u32 %v1470_v61, %v1056_v63  ;;  %v1533_v10 = vld [vmem:[#allocation5 + $0x244] sm:$0xf0]  ;;  %s1000_s19 = sshll.u32 %s1796_s5, 4  ;;  %s1001_s19 = int_to_ptr.hbm [resolvable:$true] %s1000_s19 }
  0x33   :  { %681 = vmatpush.bf16.msra.mxu0 %v1015_v31  ;;  %v1120_v3 = vld [vmem:[#allocation5 + $0xd8] sm:$0xf0]  ;;  %v1764_v4 = vpack.c.bf16 %v81_v0, %v81_v0  ;;  %v1366_v11 = vld [vmem:[#allocation5 + $0x2c0] sm:$0xf]  ;;  %v83_v12 = vld [vmem:[#allocation2 + $0x18] sm:$0xff]  ;;  %v1303_v20 = vor.u32 %v1533_v10, %v1302_v7 }
  0x34   :  { %694 = vmatpush.bf16.msra.mxu1 %v1079_v35  ;;  %v1123_v13 = vor.u32 %v1486_v2, %v1120_v3  ;;  %v1549_v14 = vld [vmem:[#allocation5 + $0x2c4] sm:$0xf0]  ;;  %v1468_v15 = vld [vmem:[#allocation5 + $0x44] sm:$0xf]  ;;  %v1048_v16 = vld [vmem:[#allocation5 + $0x48] sm:$0xf0]  ;;  %v1769_v17 = vpack.c.bf16 %v83_v12, %v83_v12 }
  0x35   :  { %707 = vmatpush.bf16.msra.mxu2 %v1143_v36  ;;  %v1484_v18 = vld [vmem:[#allocation5 + $0xc4] sm:$0xf]  ;;  %v1112_v19 = vld [vmem:[#allocation5 + $0xc8] sm:$0xf0]  ;;  %v1367_v21 = vor.u32 %v1549_v14, %v1366_v11  ;;  %v1051_v22 = vor.u32 %v1468_v15, %v1048_v16  ;;  %v1294_v23 = vld [vmem:[#allocation5 + $0x230] sm:$0xf] }
  0x36   :  { %720 = vmatpush.bf16.msra.mxu3 %v1207_v39  ;;  %682 = vmatmul.bf16.vlgmr.msra.gmra.mxu0 %v1761_v56  ;;  %v1531_v24 = vld [vmem:[#allocation5 + $0x234] sm:$0xf0]  ;;  %v1358_v25 = vld [vmem:[#allocation5 + $0x2b0] sm:$0xf]  ;;  %v1115_v26 = vor.u32 %v1484_v18, %v1112_v19  ;;  %v1466_v28 = vld [vmem:[#allocation5 + $0x34] sm:$0xf] }
  0x37   :  { %726 = vmatpush.bf16.msrb.mxu0 %v1327_v40  ;;  %695 = vmatmul.bf16.vlgmr.msra.gmra.mxu1 %v1764_v4  ;;  %v1547_v27 = vld [vmem:[#allocation5 + $0x2b4] sm:$0xf0]  ;;  %v1040_v29 = vld [vmem:[#allocation5 + $0x38] sm:$0xf0]  ;;  %v1482_v30 = vld [vmem:[#allocation5 + $0xb4] sm:$0xf]  ;;  %v1295_v32 = vor.u32 %v1531_v24, %v1294_v23 }
  0x38   :  { %739 = vmatpush.bf16.msrb.mxu1 %v1391_v41  ;;  %708 = vmatmul.bf16.vlgmr.msra.gmra.mxu2 %v1766_v5  ;;  %v1104_v31 = vld [vmem:[#allocation5 + $0xb8] sm:$0xf0]  ;;  %v1359_v33 = vor.u32 %v1547_v27, %v1358_v25  ;;  %v1043_v34 = vor.u32 %v1466_v28, %v1040_v29  ;;  %v1286_v35 = vld [vmem:[#allocation5 + $0x220] sm:$0xf]  ;;  %v1529_v36 = vld [vmem:[#allocation5 + $0x224] sm:$0xf0] }
  0x39   :  { %752 = vmatpush.bf16.msrb.mxu2 %v1075_v42  ;;  %721 = vmatmul.bf16.vlgmr.msra.gmra.mxu3 %v1769_v17  ;;  %v1350_v37 = vld [vmem:[#allocation5 + $0x2a0] sm:$0xf]  ;;  %v1107_v38 = vor.u32 %v1482_v30, %v1104_v31  ;;  %v1545_v39 = vld [vmem:[#allocation5 + $0x2a4] sm:$0xf0]  ;;  %v1464_v40 = vld [vmem:[#allocation5 + $0x24] sm:$0xf]  ;;  %v1287_v44 = vor.u32 %v1529_v36, %v1286_v35 }
  0x3a   :  { %765 = vmatpush.bf16.msrb.mxu3 %v1139_v46  ;;  %v1032_v41 = vld [vmem:[#allocation5 + $0x28] sm:$0xf0]  ;;  %v1480_v42 = vld [vmem:[#allocation5 + $0xa4] sm:$0xf]  ;;  %v1351_v45 = vor.u32 %v1545_v39, %v1350_v37  ;;  %v1278_v47 = vld [vmem:[#allocation5 + $0x210] sm:$0xf] }
  0x3b   :  { %727 = vmatpush.bf16.msrb.mxu0 %v1319_v53  ;;  %v1096_v43 = vld [vmem:[#allocation5 + $0xa8] sm:$0xf0]  ;;  %v1035_v46 = vor.u32 %v1464_v40, %v1032_v41  ;;  %v1527_v48 = vld [vmem:[#allocation5 + $0x214] sm:$0xf0]  ;;  %v1342_v49 = vld [vmem:[#allocation5 + $0x290] sm:$0xf] }
  0x3c   :  { %740 = vmatpush.bf16.msrb.mxu1 %v1383_v57  ;;  %v1099_v50 = vor.u32 %v1480_v42, %v1096_v43  ;;  %v1543_v51 = vld [vmem:[#allocation5 + $0x294] sm:$0xf0]  ;;  %v1462_v52 = vld [vmem:[#allocation5 + $0x14] sm:$0xf]  ;;  %v1024_v53 = vld [vmem:[#allocation5 + $0x18] sm:$0xf0]  ;;  %v1279_v57 = vor.u32 %v1527_v48, %v1278_v47 }
  0x3d   :  { %753 = vmatpush.bf16.msrb.mxu2 %v1067_v58  ;;  %v1478_v54 = vld [vmem:[#allocation5 + $0x94] sm:$0xf]  ;;  %v1088_v55 = vld [vmem:[#allocation5 + $0x98] sm:$0xf0]  ;;  %v1270_v58 = vld [vmem:[#allocation5 + $0x200] sm:$0xf]  ;;  %v1343_v60 = vor.u32 %v1543_v51, %v1342_v49  ;;  %v1027_v61 = vor.u32 %v1462_v52, %v1024_v53 }
  0x3e   :  { %766 = vmatpush.bf16.msrb.mxu3 %v1131_v62  ;;  %v1525_v59 = vld [vmem:[#allocation5 + $0x204] sm:$0xf0]  ;;  %v1334_v62 = vld [vmem:[#allocation5 + $0x280] sm:$0xf]  ;;  %v1460_v0 = vld [vmem:[#allocation5 + $0x4] sm:$0xf]  ;;  %v1091_v1 = vor.u32 %v1478_v54, %v1088_v55 }
  0x3f   :  { %728 = vmatpush.bf16.msrb.mxu0 %v1311_v6  ;;  %v1541_v63 = vld [vmem:[#allocation5 + $0x284] sm:$0xf0]  ;;  %v1016_v2 = vld [vmem:[#allocation5 + $0x8] sm:$0xf0]  ;;  %v1476_v3 = vld [vmem:[#allocation5 + $0x84] sm:$0xf]  ;;  %v1271_v10 = vor.u32 %v1525_v59, %v1270_v58 }
  0x40   :  { %741 = vmatpush.bf16.msrb.mxu1 %v1375_v8  ;;  %v1080_v6 = vld [vmem:[#allocation5 + $0x88] sm:$0xf0]  ;;  %v1506_v7 = vld [vmem:[#allocation5 + $0x174] sm:$0xf]  ;;  %v1200_v8 = vld [vmem:[#allocation5 + $0x178] sm:$0xf0]  ;;  %v1335_v14 = vor.u32 %v1541_v63, %v1334_v62  ;;  %v1019_v15 = vor.u32 %v1460_v0, %v1016_v2 }
  0x41   :  { %754 = vmatpush.bf16.msrb.mxu2 %v1059_v9  ;;  %v1522_v9 = vld [vmem:[#allocation5 + $0x1f4] sm:$0xf]  ;;  %v1264_v11 = vld [vmem:[#allocation5 + $0x1f8] sm:$0xf0]  ;;  %v1504_v25 = vld [vmem:[#allocation5 + $0x164] sm:$0xf] }
  0x42   :  { %767 = vmatpush.bf16.msrb.mxu3 %v1123_v13  ;;  %v1538_v12 = vld [vmem:[#allocation5 + $0x274] sm:$0xf]  ;;  %v1328_v13 = vld [vmem:[#allocation5 + $0x278] sm:$0xf0]  ;;  %v1267_v23 = vor.u32 %v1522_v9, %v1264_v11  ;;  %v1520_v27 = vld [vmem:[#allocation5 + $0x1e4] sm:$0xf] }
  0x43   :  { %729 = vmatpush.bf16.msrb.mxu0 %v1303_v20  ;;  %v1554_v16 = vld [vmem:[#allocation5 + $0x2f4] sm:$0xf]  ;;  %v1392_v18 = vld [vmem:[#allocation5 + $0x2f8] sm:$0xf0]  ;;  %v1083_v20 = vor.u32 %v1476_v3, %v1080_v6  ;;  %v1331_v24 = vor.u32 %v1538_v12, %v1328_v13  ;;  %v1256_v30 = vld [vmem:[#allocation5 + $0x1e8] sm:$0xf0] }
  0x44   :  { %742 = vmatpush.bf16.msrb.mxu1 %v1367_v21  ;;  %v84_v19 = vld [vmem:[#allocation2 + $0x20] sm:$0xff]  ;;  %v1203_v21 = vor.u32 %v1506_v7, %v1200_v8  ;;  %v1395_v28 = vor.u32 %v1554_v16, %v1392_v18  ;;  %v1536_v31 = vld [vmem:[#allocation5 + $0x264] sm:$0xf]  ;;  %v1384_v35 = vld [vmem:[#allocation5 + $0x2e8] sm:$0xf0]  ;;  %v1259_v37 = vor.u32 %v1520_v27, %v1256_v30 }
  0x45   :  { %755 = vmatpush.bf16.msrb.mxu2 %v1051_v22  ;;  %v85_v22 = vld [vmem:[#allocation2 + $0x28] sm:$0xff]  ;;  %v1773_v29 = vpack.c.bf16 %v84_v19, %v84_v19  ;;  %v1502_v39 = vld [vmem:[#allocation5 + $0x154] sm:$0xf]  ;;  %v1500_v51 = vld [vmem:[#allocation5 + $0x144] sm:$0xf] }
  0x46   :  { %768 = vmatpush.bf16.msrb.mxu3 %v1115_v26  ;;  %v1192_v26 = vld [vmem:[#allocation5 + $0x168] sm:$0xf0]  ;;  %v1184_v40 = vld [vmem:[#allocation5 + $0x158] sm:$0xf0]  ;;  %v1518_v41 = vld [vmem:[#allocation5 + $0x1d4] sm:$0xf] }
  0x47   :  { %730 = vmatpush.bf16.msrb.mxu0 %v1295_v32  ;;  %v1320_v32 = vld [vmem:[#allocation5 + $0x268] sm:$0xf0]  ;;  %v1195_v36 = vor.u32 %v1504_v25, %v1192_v26  ;;  %v1248_v43 = vld [vmem:[#allocation5 + $0x1d8] sm:$0xf0]  ;;  %v1187_v48 = vor.u32 %v1502_v39, %v1184_v40  ;;  %v1516_v53 = vld [vmem:[#allocation5 + $0x1c4] sm:$0xf] }
  0x48   :  { %743 = vmatpush.bf16.msrb.mxu1 %v1359_v33  ;;  %v1775_v33 = vpack.c.bf16 %v85_v22, %v85_v22  ;;  %v1376_v47 = vld [vmem:[#allocation5 + $0x2d8] sm:$0xf0]  ;;  %v1251_v49 = vor.u32 %v1518_v41, %v1248_v43  ;;  %v1176_v52 = vld [vmem:[#allocation5 + $0x148] sm:$0xf0]  ;;  %v1548_v59 = vld [vmem:[#allocation5 + $0x2c4] sm:$0xf] }
  0x49   :  { %756 = vmatpush.bf16.msrb.mxu2 %v1043_v34  ;;  %v1552_v34 = vld [vmem:[#allocation5 + $0x2e4] sm:$0xf]  ;;  %v1240_v55 = vld [vmem:[#allocation5 + $0x1c8] sm:$0xf0]  ;;  %v1498_v62 = vld [vmem:[#allocation5 + $0x134] sm:$0xf] }
  0x4a   :  { %769 = vmatpush.bf16.msrb.mxu3 %v1107_v38  ;;  %v1323_v38 = vor.u32 %v1536_v31, %v1320_v32  ;;  %v1387_v42 = vor.u32 %v1552_v34, %v1384_v35  ;;  %v1304_v58 = vld [vmem:[#allocation5 + $0x248] sm:$0xf0]  ;;  %v1168_v63 = vld [vmem:[#allocation5 + $0x138] sm:$0xf0]  ;;  %v1514_v0 = vld [vmem:[#allocation5 + $0x1b4] sm:$0xf] }
  0x4b   :  { %731 = vmatpush.bf16.msrb.mxu0 %v1287_v44  ;;  %v1534_v44 = vld [vmem:[#allocation5 + $0x254] sm:$0xf]  ;;  %v1232_v2 = vld [vmem:[#allocation5 + $0x1b8] sm:$0xf0]  ;;  %v1171_v9 = vor.u32 %v1498_v62, %v1168_v63  ;;  %v1496_v12 = vld [vmem:[#allocation5 + $0x124] sm:$0xf] }
  0x4c   :  { %744 = vmatpush.bf16.msrb.mxu1 %v1351_v45  ;;  %v1312_v45 = vld [vmem:[#allocation5 + $0x258] sm:$0xf0]  ;;  %v1530_v3 = vld [vmem:[#allocation5 + $0x234] sm:$0xf]  ;;  %v1160_v13 = vld [vmem:[#allocation5 + $0x128] sm:$0xf0] }
  0x4d   :  { %757 = vmatpush.bf16.msrb.mxu2 %v1035_v46  ;;  %v1550_v46 = vld [vmem:[#allocation5 + $0x2d4] sm:$0xf]  ;;  %v1296_v6 = vld [vmem:[#allocation5 + $0x238] sm:$0xf0]  ;;  %v1224_v16 = vld [vmem:[#allocation5 + $0x1a8] sm:$0xf0]  ;;  %v1163_v22 = vor.u32 %v1496_v12, %v1160_v13 }
  0x4e   :  { %770 = vmatpush.bf16.msrb.mxu3 %v1099_v50  ;;  %v1315_v50 = vor.u32 %v1534_v44, %v1312_v45  ;;  %v1379_v54 = vor.u32 %v1550_v46, %v1376_v47  ;;  %v1546_v7 = vld [vmem:[#allocation5 + $0x2b4] sm:$0xf]  ;;  %v1360_v8 = vld [vmem:[#allocation5 + $0x2b8] sm:$0xf0]  ;;  %v1299_v11 = vor.u32 %v1530_v3, %v1296_v6  ;;  %v1528_v18 = vld [vmem:[#allocation5 + $0x224] sm:$0xf] }
  0x4f   :  { %732 = vmatpush.bf16.msrb.mxu0 %v1279_v57  ;;  %v1532_v57 = vld [vmem:[#allocation5 + $0x244] sm:$0xf]  ;;  %v1288_v19 = vld [vmem:[#allocation5 + $0x228] sm:$0xf0]  ;;  %v1494_v25 = vld [vmem:[#allocation5 + $0x114] sm:$0xf] }
  0x50   :  { %745 = vmatpush.bf16.msrb.mxu1 %v1343_v60  ;;  %v1179_v60 = vor.u32 %v1500_v51, %v1176_v52  ;;  %v1152_v26 = vld [vmem:[#allocation5 + $0x118] sm:$0xf0]  ;;  %v1510_v27 = vld [vmem:[#allocation5 + $0x194] sm:$0xf]  ;;  %v1492_v39 = vld [vmem:[#allocation5 + $0x104] sm:$0xf] }
  0x51   :  { %758 = vmatpush.bf16.msrb.mxu2 %v1027_v61  ;;  %v1243_v61 = vor.u32 %v1516_v53, %v1240_v55  ;;  %v1216_v30 = vld [vmem:[#allocation5 + $0x198] sm:$0xf0]  ;;  %v1526_v31 = vld [vmem:[#allocation5 + $0x214] sm:$0xf]  ;;  %v1144_v40 = vld [vmem:[#allocation5 + $0x108] sm:$0xf0] }
  0x52   :  { %771 = vmatpush.bf16.msrb.mxu3 %v1091_v1  ;;  %v1280_v32 = vld [vmem:[#allocation5 + $0x218] sm:$0xf0]  ;;  %v1542_v34 = vld [vmem:[#allocation5 + $0x294] sm:$0xf]  ;;  %v1508_v41 = vld [vmem:[#allocation5 + $0x184] sm:$0xf] }
  0x53   :  { %733 = vmatpush.bf16.msrb.mxu0 %v1271_v10  ;;  %v1235_v10 = vor.u32 %v1514_v0, %v1232_v2  ;;  %v1344_v35 = vld [vmem:[#allocation5 + $0x298] sm:$0xf0]  ;;  %v1208_v43 = vld [vmem:[#allocation5 + $0x188] sm:$0xf0]  ;;  %v1524_v44 = vld [vmem:[#allocation5 + $0x204] sm:$0xf] }
  0x54   :  { %746 = vmatpush.bf16.msrb.mxu1 %v1335_v14  ;;  %v1512_v14 = vld [vmem:[#allocation5 + $0x1a4] sm:$0xf]  ;;  %v1272_v45 = vld [vmem:[#allocation5 + $0x208] sm:$0xf0]  ;;  %v1563_v52 = vld [vmem:[#allocation8 + $0x38] sm:$0xff] }
  0x55   :  { %759 = vmatpush.bf16.msrb.mxu2 %v1019_v15  ;;  %v1363_v15 = vor.u32 %v1546_v7, %v1360_v8  ;;  %v1540_v46 = vld [vmem:[#allocation5 + $0x284] sm:$0xf]  ;;  %v1336_v47 = vld [vmem:[#allocation5 + $0x288] sm:$0xf0]  ;;  %v1562_v53 = vld [vmem:[#allocation8 + $0x30] sm:$0xff] }
  0x56   :  { %772 = vmatpush.bf16.msrb.mxu3 %v1083_v20  ;;  %734 = vmatmul.bf16.vlgmr.msrb.gmra.mxu0 %v1773_v29  ;;  %v1544_v20 = vld [vmem:[#allocation5 + $0x2a4] sm:$0xf]  ;;  %v1339_v51 = vor.u32 %v1540_v46, %v1336_v47  ;;  %v1566_v13 = vld [vmem:[#allocation8 + $0x50] sm:$0xff] }
  0x57   :  { %778 = vmatpush.bf16.msra.mxu0 %v1203_v21  ;;  %747 = vmatmul.bf16.vlgmr.msrb.gmra.mxu1 %v1775_v33  ;;  %v1352_v21 = vld [vmem:[#allocation5 + $0x2a8] sm:$0xf0]  ;;  %v1560_v55 = vld [vmem:[#allocation8 + $0x20] sm:$0xff] }
  0x58   :  { %791 = vmatpush.bf16.msra.mxu1 %v1267_v23  ;;  %760 = vmatmul.bf16.vlgmr.msrb.gmra.mxu2 %v1761_v56  ;;  %v1368_v56 = vld [vmem:[#allocation5 + $0x2c8] sm:$0xf0]  ;;  %v1227_v23 = vor.u32 %v1512_v14, %v1224_v16  ;;  %v1568_v3 = vld [vmem:[#allocation8 + $0x60] sm:$0xff] }
  0x59   :  { %804 = vmatpush.bf16.msra.mxu2 %v1331_v24  ;;  %773 = vmatmul.bf16.vlgmr.msrb.gmra.mxu3 %v1764_v4  ;;  %v1307_v4 = vor.u32 %v1532_v57, %v1304_v58  ;;  %v1371_v1 = vor.u32 %v1548_v59, %v1368_v56  ;;  %v1291_v24 = vor.u32 %v1528_v18, %v1288_v19  ;;  %v1559_v57 = vld [vmem:[#allocation8 + $0x18] sm:$0xff]  ;;  %v1558_v58 = vld [vmem:[#allocation8 + $0x10] sm:$0xff]  ;;  %v1557_v56 = vld [vmem:[#allocation8 + $0x8] sm:$0xff] }
  0x5a   :  { %817 = vmatpush.bf16.msra.mxu3 %v1395_v28  ;;  %v1355_v28 = vor.u32 %v1544_v20, %v1352_v21  ;;  %v1565_v19 = vld [vmem:[#allocation8 + $0x48] sm:$0xff] }
  0x5b   :  { %779 = vmatpush.bf16.msra.mxu0 %v1195_v36  ;;  %v1155_v36 = vor.u32 %v1494_v25, %v1152_v26  ;;  %v1564_v25 = vld [vmem:[#allocation8 + $0x40] sm:$0xff] }
  0x5c   :  { %792 = vmatpush.bf16.msra.mxu1 %v1259_v37  ;;  %v1219_v37 = vor.u32 %v1510_v27, %v1216_v30 }
  0x5d   :  { %805 = vmatpush.bf16.msra.mxu2 %v1323_v38  ;;  %v1283_v38 = vor.u32 %v1526_v31, %v1280_v32 }
  0x5e   :  { %818 = vmatpush.bf16.msra.mxu3 %v1387_v42  ;;  %v1347_v42 = vor.u32 %v1542_v34, %v1344_v35 }
  0x5f   :  { %780 = vmatpush.bf16.msra.mxu0 %v1187_v48  ;;  %v1147_v48 = vor.u32 %v1492_v39, %v1144_v40 }
  0x60   :  { %793 = vmatpush.bf16.msra.mxu1 %v1251_v49  ;;  %v1211_v49 = vor.u32 %v1508_v41, %v1208_v43 }
  0x61   :  { %806 = vmatpush.bf16.msra.mxu2 %v1315_v50  ;;  %v1275_v50 = vor.u32 %v1524_v44, %v1272_v45 }
  0x62   :  { %819 = vmatpush.bf16.msra.mxu3 %v1379_v54  ;;  %v1561_v54 = vld [vmem:[#allocation8 + $0x28] sm:$0xff] }
  0x63   :  { %781 = vmatpush.bf16.msra.mxu0 %v1179_v60 }
  0x64   :  { %794 = vmatpush.bf16.msra.mxu1 %v1243_v61 }
  0x65   :  { %807 = vmatpush.bf16.msra.mxu2 %v1307_v4 }
  0x66   :  { %820 = vmatpush.bf16.msra.mxu3 %v1371_v1  ;;  %v1569_v1 = vld [vmem:[#allocation8 + $0x68] sm:$0xff] }
  0x67   :  { %782 = vmatpush.bf16.msra.mxu0 %v1171_v9 }
  0x68   :  { %795 = vmatpush.bf16.msra.mxu1 %v1235_v10 }
  0x69   :  { %808 = vmatpush.bf16.msra.mxu2 %v1299_v11  ;;  %v1567_v11 = vld [vmem:[#allocation8 + $0x58] sm:$0xff] }
  0x6a   :  { %821 = vmatpush.bf16.msra.mxu3 %v1363_v15 }
  0x6b   :  { %783 = vmatpush.bf16.msra.mxu0 %v1163_v22 }
  0x6c   :  { %796 = vmatpush.bf16.msra.mxu1 %v1227_v23 }
  0x6d   :  { %809 = vmatpush.bf16.msra.mxu2 %v1291_v24 }
  0x6e   :  { %822 = vmatpush.bf16.msra.mxu3 %v1355_v28 }
  0x6f   :  { %784 = vmatpush.bf16.msra.mxu0 %v1155_v36 }
  0x70   :  { %797 = vmatpush.bf16.msra.mxu1 %v1219_v37 }
  0x71   :  { %810 = vmatpush.bf16.msra.mxu2 %v1283_v38 }
  0x72   :  { %823 = vmatpush.bf16.msra.mxu3 %v1347_v42 }
  0x73   :  { %785 = vmatpush.bf16.msra.mxu0 %v1147_v48 }
  0x74   :  { %798 = vmatpush.bf16.msra.mxu1 %v1211_v49  ;;  %v1581_v49 = vld [vmem:[%s1795_s4] ss:$0 sm:$0xff] }
  0x75   :  { %811 = vmatpush.bf16.msra.mxu2 %v1275_v50 }
  0x76   :  { %824 = vmatpush.bf16.msra.mxu3 %v1339_v51  ;;  %786 = vmatmul.bf16.vlgmr.msra.gmra.mxu0 %v1766_v5  ;;  %v1556_v5 = vld [vmem:[#allocation8] sm:$0xff] }
  0x77   :  { %966 = vmatpush.bf16.msrb.mxu0 %v1563_v52  ;;  %799 = vmatmul.bf16.vlgmr.msra.gmra.mxu1 %v1769_v17  ;;  %v188_v17 = vld [vmem:[#allocation7] sm:$0x3] }
  0x78   :  { %812 = vmatmul.bf16.vlgmr.msra.gmra.mxu2 %v1773_v29  ;;  %v1571_v29 = vld [vmem:[#allocation8 + $0x78] sm:$0xff]  ;;  %v190_v4 = vperm.slane %v188_v17, 0  ;;  %v191_v28 = vperm.slane %v188_v17, 1 }
  0x79   :  { %825 = vmatmul.bf16.vlgmr.msra.gmra.mxu3 %v1775_v33  ;;  %979 = vmatpush.bf16.msrb.mxu1 %v1571_v29  ;;  %v1570_v33 = vld [vmem:[#allocation8 + $0x70] sm:$0xff] }
  0x7b   :  { %967 = vmatpush.bf16.msrb.mxu0 %v1562_v53 }
  0x7d   :  { %980 = vmatpush.bf16.msrb.mxu1 %v1570_v33 }
  0x7f   :  { %968 = vmatpush.bf16.msrb.mxu0 %v1561_v54 }
  0x81   :  { %981 = vmatpush.bf16.msrb.mxu1 %v1569_v1 }
  0x83   :  { %969 = vmatpush.bf16.msrb.mxu0 %v1560_v55 }
  0x85   :  { %982 = vmatpush.bf16.msrb.mxu1 %v1568_v3 }
  0x87   :  { %970 = vmatpush.bf16.msrb.mxu0 %v1559_v57 }
  0x89   :  { %983 = vmatpush.bf16.msrb.mxu1 %v1567_v11 }
  0x8b   :  { %971 = vmatpush.bf16.msrb.mxu0 %v1558_v58 }
  0x8d   :  { %984 = vmatpush.bf16.msrb.mxu1 %v1566_v13 }
  0x8f   :  { %972 = vmatpush.bf16.msrb.mxu0 %v1557_v56 }
  0x91   :  { %985 = vmatpush.bf16.msrb.mxu1 %v1565_v19 }
  0x93   :  { %973 = vmatpush.bf16.msrb.mxu0 %v1556_v5 }
  0x95   :  { %986 = vmatpush.bf16.msrb.mxu1 %v1564_v25 }
  0xb3   :  { %v683_v59 = vpop.f32.mrf.mxu0 }
  0xb4   :  { %v696_v60 = vpop.f32.mrf.mxu1  ;;  %v684_v2 = vadd.f32 %v683_v59, %v190_v4 }
  0xb6   :  { %v697_v6 = vadd.f32 %v696_v60, %v684_v2 }
  0xbb   :  { %v685_v61 = vpop.f32.mrf.mxu0  ;;  %v709_v62 = vpop.f32.mrf.mxu2 }
  0xbc   :  { %v698_v63 = vpop.f32.mrf.mxu1  ;;  %v722_v0 = vpop.f32.mrf.mxu3  ;;  %v710_v9 = vadd.f32 %v709_v62, %v697_v6 }
  0xbe   :  { %v723_v10 = vadd.f32 %v722_v0, %v710_v9 }
  0xc3   :  { %v711_v7 = vpop.f32.mrf.mxu2 }
  0xc4   :  { %v724_v8 = vpop.f32.mrf.mxu3 }
  0xd3   :  { %v735_v12 = vpop.f32.mrf.mxu0 }
  0xd4   :  { %v736_v14 = vadd.f32 %v735_v12, %v723_v10  ;;  %v748_v15 = vpop.f32.mrf.mxu1 }
  0xd6   :  { %v749_v16 = vadd.f32 %v748_v15, %v736_v14 }
  0xd8   :  { %v830_v18 = vmax.f32 %v749_v16, 0.0 }
  0xda   :  { %v832_v20 = vpack.c.bf16 %v830_v18, %v830_v18 }
  0xdb   :  { %v761_v21 = vpop.f32.mrf.mxu2  ;;  %v737_v23 = vpop.f32.mrf.mxu0 }
  0xdc   :  { %v774_v22 = vpop.f32.mrf.mxu3  ;;  %974 = vmatmul.bf16.vlgmr.msrb.gmra.mxu0 %v832_v20  ;;  %v750_v24 = vpop.f32.mrf.mxu1  ;;  %v762_v30 = vadd.f32 %v761_v21, %v191_v28 }
  0xde   :  { %v775_v31 = vadd.f32 %v774_v22, %v762_v30 }
  0xe3   :  { %v763_v26 = vpop.f32.mrf.mxu2 }
  0xe4   :  { %v776_v27 = vpop.f32.mrf.mxu3 }
  0xf3   :  { %v787_v32 = vpop.f32.mrf.mxu0 }
  0xf4   :  { %v800_v34 = vpop.f32.mrf.mxu1  ;;  %v788_v35 = vadd.f32 %v787_v32, %v775_v31 }
  0xf6   :  { %v801_v36 = vadd.f32 %v800_v34, %v788_v35 }
  0xfb   :  { %v813_v37 = vpop.f32.mrf.mxu2  ;;  %v789_v40 = vpop.f32.mrf.mxu0 }
  0xfc   :  { %v814_v38 = vadd.f32 %v813_v37, %v801_v36  ;;  %v826_v39 = vpop.f32.mrf.mxu3  ;;  %v802_v41 = vpop.f32.mrf.mxu1 }
  0xfe   :  { %v827_v42 = vadd.f32 %v826_v39, %v814_v38 }
 0x100   :  { %v831_v43 = vmax.f32 %v827_v42, 0.0 }
 0x102   :  { %v833_v44 = vpack.c.bf16 %v831_v43, %v831_v43 }
 0x103   :  { %v815_v45 = vpop.f32.mrf.mxu2 }
 0x104   :  { %v828_v46 = vpop.f32.mrf.mxu3  ;;  %987 = vmatmul.bf16.vlgmr.msrb.gmra.mxu1 %v833_v44 }
 0x159   :  { %v975_v47 = vpop.f32.mrf.mxu0 }
 0x15a   :  { %v976_v50 = vadd.f32 %v1581_v49, %v975_v47 }
 0x161   :  { %v977_v48 = vpop.f32.mrf.mxu0 }
 0x181   :  { %v988_v51 = vpop.f32.mrf.mxu1 }
 0x182   :  { %v989_v52 = vadd.f32 %v988_v51, %v976_v50 }
 0x184   :  { %992 = vst [vmem:[#allocation10] sm:$0xff] %v989_v52 }
 0x185   :  { %1003 = dma.vmem_to_hbm [thread:$0]  %s999_s16, 128, %s1001_s19, [#allocation4]  }
 0x189   :  { %v990_v53 = vpop.f32.mrf.mxu1 }
 0x18a   :  { %1708 = dma.done.wait [#allocation4], 128  }
 0x18b   :  { %1709 = vsyncadd [#allocation4], 4294967168 }
 0x18c   :  { %1008 = vsyncpa [#allocation3], 1 }
 0x18d   :  { %1009 = vsyncpa [#allocation6], 1 }
 0x18e   :  { %1010 = vsyncpa [#allocation9], 1 }
 0x18f   :  { %1011 = vsyncpa [#allocation4], 1 }

</bundles_post_ra>
